<compile_context>
chip_gen: v5e
topology: v5e:2x2
jax: 0.10.0
libtpu: 0.0.40
codegen_flags: <defaults>
</compile_context>

<pallas_src>
import functools

import jax
import jax.numpy as jnp
from jax.experimental import pallas as pl
from jax.experimental.pallas import tpu as pltpu

_BN_EPS = 1e-5


# ---------------------------------------------------------------------------
# Pallas kernel: tiled  O = [ReLU](X @ W + b)  with f32 accumulation
# ---------------------------------------------------------------------------
def _matmul_bias_act_kernel(x_ref, w_ref, b_ref, o_ref, acc_ref, *, apply_relu):
    k = pl.program_id(1)

    @pl.when(k == 0)
    def _():
        acc_ref[...] = jnp.zeros_like(acc_ref)

    acc_ref[...] += jnp.dot(x_ref[...], w_ref[...],
                            preferred_element_type=jnp.float32)

    @pl.when(k == pl.num_programs(1) - 1)
    def _():
        h = acc_ref[...] + b_ref[...]        # bias added in f32
        if apply_relu:
            h = jnp.maximum(h, 0.0)          # elementwise math stays f32
        o_ref[...] = h.astype(o_ref.dtype)


def _pick_tile(dim, candidates):
    for c in candidates:
        if dim % c == 0:
            return c
    return dim


def matmul_bias_act(x, w, bias, *, apply_relu, out_dtype):
    """Tiled (M,K)@(K,F) + bias [+ ReLU].  M, K, F are multiples of 128."""
    m, k = x.shape
    _, f = w.shape
    tm = _pick_tile(m, (256, 128))
    tk = _pick_tile(k, (512, 256, 128))
    grid = (m // tm, k // tk)

    flops = 2 * m * k * f
    bytes_accessed = (x.size * x.dtype.itemsize + w.size * w.dtype.itemsize
                      + bias.size * bias.dtype.itemsize
                      + m * f * jnp.dtype(out_dtype).itemsize)

    return pl.pallas_call(
        functools.partial(_matmul_bias_act_kernel, apply_relu=apply_relu),
        out_shape=jax.ShapeDtypeStruct((m, f), out_dtype),
        grid_spec=pltpu.PrefetchScalarGridSpec(
            num_scalar_prefetch=0,
            grid=grid,
            in_specs=[
                pl.BlockSpec((tm, tk), lambda i, kk: (i, kk)),
                pl.BlockSpec((tk, f), lambda i, kk: (kk, 0)),
                pl.BlockSpec((1, f), lambda i, kk: (0, 0)),
            ],
            out_specs=pl.BlockSpec((tm, f), lambda i, kk: (i, 0)),
            scratch_shapes=[pltpu.VMEM((tm, f), jnp.float32)],
        ),
        compiler_params=pltpu.CompilerParams(
            dimension_semantics=("parallel", "arbitrary"),
            vmem_limit_bytes=32 * 1024 * 1024),
        cost_estimate=pl.CostEstimate(flops=flops, transcendentals=0,
                                      bytes_accessed=bytes_accessed),
    )(x, w, bias)


# ---------------------------------------------------------------------------
# Glue: dense symmetric-normalized adjacency from edge_index (plain JAX)
# ---------------------------------------------------------------------------
def normalized_adjacency(edge_index, edge_weight, num_nodes):
    src, dst = edge_index[0], edge_index[1]
    if edge_weight is None:
        edge_weight = jnp.ones(src.shape, dtype=jnp.float32)
    adj = jnp.zeros((num_nodes, num_nodes), dtype=jnp.float32)
    adj = adj.at[src, dst].add(edge_weight)
    # GCN convention: symmetrize + self loops, then D^-1/2 A D^-1/2.
    adj = jnp.maximum(adj, adj.T) + jnp.eye(num_nodes, dtype=jnp.float32)
    deg = jnp.sum(adj, axis=1)
    d_inv_sqrt = 1.0 / jnp.sqrt(jnp.maximum(deg, 1e-12))
    return adj * d_inv_sqrt[:, None] * d_inv_sqrt[None, :]


def _round_up(x, m):
    return ((x + m - 1) // m) * m


def _pad2d(x, rows, cols):
    return jnp.pad(x, ((0, rows - x.shape[0]), (0, cols - x.shape[1])))


# ---------------------------------------------------------------------------
# Parameters (eval-mode BN carries real running stats; PyTorch-default init)
# ---------------------------------------------------------------------------
def init_erm_params(key, input_dim, hidden, output_dim, layer_num):
    params = {"enc": []}
    dims = [input_dim] + [hidden] * layer_num
    for l in range(layer_num):
        key, kw = jax.random.split(key)
        fan_in, fan_out = dims[l], dims[l + 1]
        scale = jnp.sqrt(6.0 / (fan_in + fan_out))  # xavier-uniform
        w = jax.random.uniform(kw, (fan_in, fan_out), jnp.float32, -scale, scale)
        params["enc"].append({
            "w": w,
            "b": jnp.zeros((fan_out,), jnp.float32),
            "gamma": jnp.ones((fan_out,), jnp.float32),
            "beta": jnp.zeros((fan_out,), jnp.float32),
            "running_mean": jnp.zeros((fan_out,), jnp.float32),
            "running_var": jnp.ones((fan_out,), jnp.float32),
        })
    key, kc = jax.random.split(key)
    scale = jnp.sqrt(6.0 / (hidden + output_dim))
    params["cls_w"] = jax.random.uniform(kc, (hidden, output_dim),
                                         jnp.float32, -scale, scale)
    params["cls_b"] = jnp.zeros((output_dim,), jnp.float32)
    return params


# ---------------------------------------------------------------------------
# ERM forward (eval / inference mode)
# ---------------------------------------------------------------------------
def erm_forward(params, x, edge_index, edge_weight=None, *,
                last_activation=False, frozen=False):
    # `frozen` only disables grads / forces encoder.eval() in the reference;
    # this implementation is already eval-mode inference, so it is a no-op.
    del frozen
    num_nodes, input_dim = x.shape
    num_layers = len(params["enc"])
    hidden = params["cls_w"].shape[0]
    output_dim = params["cls_w"].shape[1]

    # Pad everything to lane-dense / tile-friendly multiples of 128.
    n_pad = max(_round_up(num_nodes, 128), 128)
    fin_pad = max(_round_up(input_dim, 128), 128)
    hid_pad = max(_round_up(hidden, 128), 128)
    out_pad = max(_round_up(output_dim, 128), 128)

    a_hat = normalized_adjacency(edge_index, edge_weight, num_nodes)
    a_hat = _pad2d(a_hat, n_pad, n_pad).astype(jnp.bfloat16)

    h = _pad2d(x, n_pad, fin_pad).astype(jnp.bfloat16)

    in_dims = [fin_pad] + [hid_pad] * num_layers
    for l, layer in enumerate(params["enc"]):
        apply_act = (l < num_layers - 1) or last_activation
        w, b = layer["w"], layer["b"]
        if apply_act:
            # Fold eval-mode BN (with real running stats + eps) into the layer:
            #   y = scale*(A@(X W)+b - mean) + beta
            #     = A@(X (W*scale)) + (scale*(b-mean) + beta)
            scale = layer["gamma"] / jnp.sqrt(layer["running_var"] + _BN_EPS)
            w_eff = w * scale[None, :]
            b_eff = scale * (b - layer["running_mean"]) + layer["beta"]
        else:
            w_eff, b_eff = w, b

        f_in, f_out = in_dims[l], hid_pad
        w_p = _pad2d(w_eff, f_in, f_out).astype(jnp.bfloat16)
        b_p = _pad2d(b_eff[None, :], 1, f_out)              # f32 (1, f_out)
        zero_b = jnp.zeros((1, f_out), jnp.float32)

        # XW hoisted out of the A-reduction: computed once per layer.
        xw = matmul_bias_act(h, w_p, zero_b, apply_relu=False,
                             out_dtype=jnp.bfloat16)
        # Tiled N x N aggregation: A_hat @ XW + b' (+ ReLU).
        h = matmul_bias_act(a_hat, xw, b_p, apply_relu=apply_act,
                            out_dtype=jnp.bfloat16)

    # Classifier: H @ Wc + bc
    wc = _pad2d(params["cls_w"], hid_pad, out_pad).astype(jnp.bfloat16)
    bc = _pad2d(params["cls_b"][None, :], 1, out_pad)
    out = matmul_bias_act(h, wc, bc, apply_relu=False, out_dtype=jnp.float32)

    return out[:num_nodes, :output_dim]
    # TODO(synk): at production graph sizes, replace the dense padded A_hat with
    # a CSR scalar-prefetch gather kernel (PrefetchScalarGridSpec over row ptrs).


# ---------------------------------------------------------------------------
if __name__ == "__main__":
    key = jax.random.PRNGKey(0)

    num_nodes = 16
    input_dim = 32
    hidden = 32
    output_dim = 16
    layer_num = 2
    num_edges = 40

    key, kx, ke = jax.random.split(key, 3)
    x = jax.random.normal(kx, (num_nodes, input_dim), dtype=jnp.float32)
    edge_index = jax.random.randint(ke, (2, num_edges), 0, num_nodes,
                                    dtype=jnp.int32)

    params = init_erm_params(key, input_dim, hidden, output_dim, layer_num)

    out = jax.block_until_ready(erm_forward(params, x, edge_index))
    assert out.shape == (num_nodes, output_dim)
    assert bool(jnp.all(jnp.isfinite(out)))
    print("KERNEL_OK")
</pallas_src>

<mosaic_0001>
module attributes {stable_mosaic.version = 11 : i64} {
  func.func @_matmul_bias_act_kernel(%arg0: i32, %arg1: i32, %arg2: memref<128x128xbf16, #tpu.memory_space<vmem>>, %arg3: memref<128x128xbf16, #tpu.memory_space<vmem>>, %arg4: memref<1x128xf32, #tpu.memory_space<vmem>>, %arg5: memref<128x128xbf16, #tpu.memory_space<vmem>>, %arg6: memref<128x128xf32, #tpu.memory_space<vmem>>) attributes {dimension_semantics = [#tpu.dimension_semantics<parallel>, #tpu.dimension_semantics<arbitrary>], iteration_bounds = array<i64: 1, 1>, scalar_prefetch = 0 : i64, scratch_operands = 1 : i64, tpu.core_type = #tpu.core_type<tc>, window_params = [{transform_indices = @transform_0, window_bounds = array<i64: 128, 128>}, {transform_indices = @transform_1, window_bounds = array<i64: 128, 128>}, {pipeline_mode = #tpu.pipeline_mode<synchronous>, transform_indices = @transform_2, window_bounds = array<i64: 1, 128>}, {transform_indices = @transform_3, window_bounds = array<i64: 128, 128>}]} {
    %c0_i32 = arith.constant 0 : i32
    %0 = arith.cmpi eq, %arg1, %c0_i32 : i32
    %1 = arith.extui %0 : i1 to i32
    %c0_i32_0 = arith.constant 0 : i32
    %2 = arith.cmpi ne, %1, %c0_i32_0 : i32
    scf.if %2 {
      %cst_10 = arith.constant 0.000000e+00 : f32
      %12 = vector.broadcast %cst_10 : f32 to vector<128x128xf32>
      %c0_11 = arith.constant 0 : index
      %c0_12 = arith.constant 0 : index
      %13 = vector.load %arg6[%c0_11, %c0_12] : memref<128x128xf32, #tpu.memory_space<vmem>>, vector<128x128xf32>
      tpu.vector_store %arg6[%c0_11, %c0_12], %12 {strides = array<i32>} : memref<128x128xf32, #tpu.memory_space<vmem>>, vector<128x128xf32>,
    } else {
    }
    %c0 = arith.constant 0 : index
    %c0_1 = arith.constant 0 : index
    %3 = vector.load %arg6[%c0, %c0_1] : memref<128x128xf32, #tpu.memory_space<vmem>>, vector<128x128xf32>
    %c0_2 = arith.constant 0 : index
    %c0_3 = arith.constant 0 : index
    %4 = vector.load %arg2[%c0_2, %c0_3] : memref<128x128xbf16, #tpu.memory_space<vmem>>, vector<128x128xbf16>
    %c0_4 = arith.constant 0 : index
    %c0_5 = arith.constant 0 : index
    %5 = vector.load %arg3[%c0_4, %c0_5] : memref<128x128xbf16, #tpu.memory_space<vmem>>, vector<128x128xbf16>
    %cst = arith.constant dense<0.000000e+00> : vector<128x128xf32>
    %6 = tpu.matmul %4, %5, %cst {dimension_numbers = #tpu.dot_dimension_numbers<[1], [0], [0], [1], [0, 0, 1, 1], [], []>} : vector<128x128xbf16>, vector<128x128xbf16>, vector<128x128xf32> -> vector<128x128xf32>
    %7 = arith.addf %3, %6 : vector<128x128xf32>
    %c0_6 = arith.constant 0 : index
    %c0_7 = arith.constant 0 : index
    %8 = vector.load %arg6[%c0_6, %c0_7] : memref<128x128xf32, #tpu.memory_space<vmem>>, vector<128x128xf32>
    tpu.vector_store %arg6[%c0_6, %c0_7], %7 {strides = array<i32>} : memref<128x128xf32, #tpu.memory_space<vmem>>, vector<128x128xf32>,
    %c0_i32_8 = arith.constant 0 : i32
    %9 = arith.cmpi eq, %arg1, %c0_i32_8 : i32
    %10 = arith.extui %9 : i1 to i32
    %c0_i32_9 = arith.constant 0 : i32
    %11 = arith.cmpi ne, %10, %c0_i32_9 : i32
    scf.if %11 {
      %c0_10 = arith.constant 0 : index
      %c0_11 = arith.constant 0 : index
      %12 = vector.load %arg6[%c0_10, %c0_11] : memref<128x128xf32, #tpu.memory_space<vmem>>, vector<128x128xf32>
      %c0_12 = arith.constant 0 : index
      %c0_13 = arith.constant 0 : index
      %13 = vector.load %arg4[%c0_12, %c0_13] : memref<1x128xf32, #tpu.memory_space<vmem>>, vector<1x128xf32>
      %14 = vector.broadcast %13 : vector<1x128xf32> to vector<128x128xf32>
      %15 = arith.addf %12, %14 : vector<128x128xf32>
      %16 = arith.truncf %15 : vector<128x128xf32> to vector<128x128xbf16>
      %c0_14 = arith.constant 0 : index
      %c0_15 = arith.constant 0 : index
      %17 = vector.load %arg5[%c0_14, %c0_15] : memref<128x128xbf16, #tpu.memory_space<vmem>>, vector<128x128xbf16>
      tpu.vector_store %arg5[%c0_14, %c0_15], %16 {strides = array<i32>} : memref<128x128xbf16, #tpu.memory_space<vmem>>, vector<128x128xbf16>,
    } else {
    }
    return
  }
  func.func @transform_0(%arg0: i32, %arg1: i32) -> (i32, i32) {
    %c0_i32 = arith.constant 0 : i32
    return %arg0, %arg1 : i32, i32
  }
  func.func @transform_1(%arg0: i32, %arg1: i32) -> (i32, i32) {
    %c0_i32 = arith.constant 0 : i32
    %c0_i32_0 = arith.constant 0 : i32
    return %arg1, %c0_i32 : i32, i32
  }
  func.func @transform_2(%arg0: i32, %arg1: i32) -> (i32, i32) {
    %c0_i32 = arith.constant 0 : i32
    %c0_i32_0 = arith.constant 0 : i32
    %c0_i32_1 = arith.constant 0 : i32
    return %c0_i32, %c0_i32_0 : i32, i32
  }
  func.func @transform_3(%arg0: i32, %arg1: i32) -> (i32, i32) {
    %c0_i32 = arith.constant 0 : i32
    %c0_i32_0 = arith.constant 0 : i32
    return %arg0, %c0_i32 : i32, i32
  }
}

</mosaic_0001>

<bundles_post_ra>
// kernel: tpu_custom_call.1
= control target key start
LH: loop header
LB: loop body
LE: loop exit
PB: predicated region body
PF: predicated region fallthrough
CT: control target
= control target key end

     0   :  { %8 = vsyncpa [#allocation4], 0  ;;  %s664_s0 = inlined_call_operand.hbm [shape: bf16[128,128], index: 0, kind: input, shape index: {}]   ;;  %s665_s1 = inlined_call_operand.hbm [shape: bf16[128,128], index: 1, kind: input, shape index: {}]   ;;  %s666_s2 = inlined_call_operand.vmem [shape: f32[1,128], index: 2, kind: input, shape index: {}]   ;;  %s667_s3 = inlined_call_operand.hbm [shape: bf16[128,128], index: 3, kind: output, shape index: {}]  }
   0x1   :  { %9 = vsyncpa [#allocation7], 0 }
   0x2   :  { %10 = vsyncpa [#allocation5], 0  ;;  %s15_s14 = sshll.u32 %s664_s0, 4  ;;  %s618_s15 = smov [#allocation3]   ;;  %s16_s14 = int_to_ptr.hbm [resolvable:$true] %s15_s14 }
   0x3   :  { %s17_s16 = sshll.u32 %s618_s15, 4  ;;  %s28_s19 = sshll.u32 %s665_s1, 4  ;;  %s18_s16 = int_to_ptr.vmem [resolvable:$true] %s17_s16  ;;  %s29_s19 = int_to_ptr.hbm [resolvable:$true] %s28_s19 }
   0x4   :  { %s619_s20 = smov 64   ;;  %s620_s21 = smov 4  }
   0x5   :  { %23 = dma.hbm_to_vmem [thread:$0]  %s16_s14, 1024, %s18_s16, [#allocation4], %s619_s20, %s619_s20, %s620_s21  }
   0x6   :  { %s621_s22 = smov [#allocation6]  }
   0x7   :  { %s30_s23 = sshll.u32 %s621_s22, 4  ;;  %s31_s23 = int_to_ptr.vmem [resolvable:$true] %s30_s23 }
   0x8   :  { %36 = dma.hbm_to_vmem [thread:$0]  %s29_s19, 1024, %s31_s23, [#allocation7], %s619_s20, %s619_s20, %s620_s21  }
   0x9   :  { %612 = dma.done.wait [#allocation4], 1024  }
   0xa   :  { %613 = vsyncadd [#allocation4], 4294966272 }
   0xb   :  { %614 = dma.done.wait [#allocation7], 1024  }
   0xc   :  { %615 = vsyncadd [#allocation7], 4294966272  ;;  %v462_v0 = vld [vmem:[#allocation6 + $0x38] sm:$0xff]  ;;  %v461_v1 = vld [vmem:[#allocation6 + $0x30] sm:$0xff]  ;;  %s369_s27 = sshll.u32 %s667_s3, 4  ;;  %s370_s27 = int_to_ptr.hbm [resolvable:$true] %s369_s27 }
   0xd   :  { %211 = vmatpush.bf16.msra.mxu0 %v462_v0  ;;  %510 = vmatpush.bf16.msra.mxu1 %v462_v0  ;;  %v460_v2 = vld [vmem:[#allocation6 + $0x28] sm:$0xff]  ;;  %v459_v3 = vld [vmem:[#allocation6 + $0x20] sm:$0xff]  ;;  %v458_v4 = vld [vmem:[#allocation6 + $0x18] sm:$0xff] }
   0xe   :  { %511 = vmatpush.bf16.msra.mxu2 %v462_v0  ;;  %512 = vmatpush.bf16.msra.mxu3 %v462_v0  ;;  %v457_v5 = vld [vmem:[#allocation6 + $0x10] sm:$0xff]  ;;  %v456_v6 = vld [vmem:[#allocation6 + $0x8] sm:$0xff]  ;;  %v455_v7 = vld [vmem:[#allocation6] sm:$0xff] }
   0xf   :  { %v447_v8 = vld [vmem:[#allocation3] sm:$0xff]  ;;  %v449_v9 = vld [vmem:[#allocation3 + $0x10] sm:$0xff]  ;;  %v448_v12 = vld [vmem:[#allocation3 + $0x8] sm:$0xff] }
  0x10   :  { %v451_v10 = vld [vmem:[#allocation3 + $0x20] sm:$0xff]  ;;  %v453_v11 = vld [vmem:[#allocation3 + $0x30] sm:$0xff]  ;;  %v450_v13 = vld [vmem:[#allocation3 + $0x18] sm:$0xff] }
  0x11   :  { %212 = vmatpush.bf16.msra.mxu0 %v461_v1  ;;  %513 = vmatpush.bf16.msra.mxu1 %v461_v1  ;;  %v452_v14 = vld [vmem:[#allocation3 + $0x28] sm:$0xff]  ;;  %v454_v15 = vld [vmem:[#allocation3 + $0x38] sm:$0xff]  ;;  %v539_v18 = vld [vmem:[%s666_s2] ss:$0 sm:$0xff]  ;;  %s622_s2 = smov [#allocation8]  }
  0x12   :  { %514 = vmatpush.bf16.msra.mxu2 %v461_v1  ;;  %515 = vmatpush.bf16.msra.mxu3 %v461_v1  ;;  %s367_s24 = sshll.u32 %s622_s2, 4  ;;  %s368_s24 = int_to_ptr.vmem [resolvable:$true] %s367_s24 }
  0x15   :  { %213 = vmatpush.bf16.msra.mxu0 %v460_v2  ;;  %516 = vmatpush.bf16.msra.mxu1 %v460_v2 }
  0x16   :  { %517 = vmatpush.bf16.msra.mxu2 %v460_v2  ;;  %518 = vmatpush.bf16.msra.mxu3 %v460_v2 }
  0x19   :  { %214 = vmatpush.bf16.msra.mxu0 %v459_v3  ;;  %519 = vmatpush.bf16.msra.mxu1 %v459_v3 }
  0x1a   :  { %520 = vmatpush.bf16.msra.mxu2 %v459_v3  ;;  %521 = vmatpush.bf16.msra.mxu3 %v459_v3 }
  0x1d   :  { %215 = vmatpush.bf16.msra.mxu0 %v458_v4  ;;  %522 = vmatpush.bf16.msra.mxu1 %v458_v4 }
  0x1e   :  { %523 = vmatpush.bf16.msra.mxu2 %v458_v4  ;;  %524 = vmatpush.bf16.msra.mxu3 %v458_v4 }
  0x21   :  { %216 = vmatpush.bf16.msra.mxu0 %v457_v5  ;;  %525 = vmatpush.bf16.msra.mxu1 %v457_v5 }
  0x22   :  { %526 = vmatpush.bf16.msra.mxu2 %v457_v5  ;;  %527 = vmatpush.bf16.msra.mxu3 %v457_v5 }
  0x25   :  { %217 = vmatpush.bf16.msra.mxu0 %v456_v6  ;;  %528 = vmatpush.bf16.msra.mxu1 %v456_v6 }
  0x26   :  { %529 = vmatpush.bf16.msra.mxu2 %v456_v6  ;;  %530 = vmatpush.bf16.msra.mxu3 %v456_v6 }
  0x29   :  { %218 = vmatpush.bf16.msra.mxu0 %v455_v7  ;;  %531 = vmatpush.bf16.msra.mxu1 %v455_v7 }
  0x2a   :  { %532 = vmatpush.bf16.msra.mxu2 %v455_v7  ;;  %533 = vmatpush.bf16.msra.mxu3 %v455_v7 }
  0x2c   :  { %219 = vmatmul.bf16.vlgmr.msra.gmra.mxu0 %v447_v8  ;;  %229 = vmatmul.bf16.vlgmr.msra.gmra.mxu1 %v449_v9 }
  0x2d   :  { %239 = vmatmul.bf16.vlgmr.msra.gmra.mxu2 %v451_v10  ;;  %249 = vmatmul.bf16.vlgmr.msra.gmra.mxu3 %v453_v11 }
  0x3c   :  { %224 = vmatmul.bf16.gmra.mxu0 %v448_v12  ;;  %234 = vmatmul.bf16.gmra.mxu1 %v450_v13 }
  0x3d   :  { %244 = vmatmul.bf16.gmra.mxu2 %v452_v14  ;;  %254 = vmatmul.bf16.gmra.mxu3 %v454_v15 }
  0xa9   :  { %v220_v16 = vpop.f32.mrf.mxu0  ;;  %v230_v17 = vpop.f32.mrf.mxu1 }
  0xaa   :  { %v315_v23 = vadd.f32 %v539_v18, %v220_v16  ;;  %v319_v24 = vadd.f32 %v539_v18, %v230_v17 }
  0xb0   :  { %v240_v19 = vpop.f32.mrf.mxu2  ;;  %v250_v20 = vpop.f32.mrf.mxu3 }
  0xb1   :  { %v222_v21 = vpop.f32.mrf.mxu0  ;;  %v232_v22 = vpop.f32.mrf.mxu1  ;;  %v323_v31 = vadd.f32 %v539_v18, %v240_v19  ;;  %v327_v32 = vadd.f32 %v539_v18, %v250_v20 }
  0xb2   :  { %v316_v25 = vadd.f32 %v539_v18, %v222_v21  ;;  %v320_v26 = vadd.f32 %v539_v18, %v232_v22 }
  0xb4   :  { %v466_v27 = vpack.c.bf16 %v316_v25, %v315_v23  ;;  %v476_v28 = vpack.c.bf16 %v320_v26, %v319_v24 }
  0xb6   :  { %467 = vst [vmem:[#allocation8] sm:$0xff] %v466_v27  }
  0xb7   :  { %504 = vst [vmem:[#allocation8 + $0x10] sm:$0xff] %v476_v28  }
  0xb8   :  { %v242_v29 = vpop.f32.mrf.mxu2  ;;  %v252_v30 = vpop.f32.mrf.mxu3 }
  0xb9   :  { %v324_v33 = vadd.f32 %v539_v18, %v242_v29  ;;  %v328_v34 = vadd.f32 %v539_v18, %v252_v30  ;;  %v225_v35 = vpop.f32.mrf.mxu0  ;;  %v235_v36 = vpop.f32.mrf.mxu1 }
  0xba   :  { %v317_v43 = vadd.f32 %v539_v18, %v225_v35  ;;  %v321_v44 = vadd.f32 %v539_v18, %v235_v36 }
  0xbb   :  { %v486_v37 = vpack.c.bf16 %v324_v33, %v323_v31  ;;  %v496_v38 = vpack.c.bf16 %v328_v34, %v327_v32 }
  0xbd   :  { %506 = vst [vmem:[#allocation8 + $0x20] sm:$0xff] %v486_v37  }
  0xbe   :  { %508 = vst [vmem:[#allocation8 + $0x30] sm:$0xff] %v496_v38  }
  0xc0   :  { %v245_v39 = vpop.f32.mrf.mxu2  ;;  %v255_v40 = vpop.f32.mrf.mxu3 }
  0xc1   :  { %v227_v41 = vpop.f32.mrf.mxu0  ;;  %v237_v42 = vpop.f32.mrf.mxu1  ;;  %v325_v51 = vadd.f32 %v539_v18, %v245_v39  ;;  %v329_v52 = vadd.f32 %v539_v18, %v255_v40 }
  0xc2   :  { %v318_v45 = vadd.f32 %v539_v18, %v227_v41  ;;  %v322_v46 = vadd.f32 %v539_v18, %v237_v42 }
  0xc4   :  { %v471_v47 = vpack.c.bf16 %v318_v45, %v317_v43  ;;  %v481_v48 = vpack.c.bf16 %v322_v46, %v321_v44 }
  0xc6   :  { %503 = vst [vmem:[#allocation8 + $0x8] sm:$0xff] %v471_v47  }
  0xc7   :  { %505 = vst [vmem:[#allocation8 + $0x18] sm:$0xff] %v481_v48  }
  0xc8   :  { %v247_v49 = vpop.f32.mrf.mxu2  ;;  %v257_v50 = vpop.f32.mrf.mxu3 }
  0xc9   :  { %v326_v53 = vadd.f32 %v539_v18, %v247_v49  ;;  %v330_v54 = vadd.f32 %v539_v18, %v257_v50 }
  0xcb   :  { %v491_v55 = vpack.c.bf16 %v326_v53, %v325_v51  ;;  %v501_v56 = vpack.c.bf16 %v330_v54, %v329_v52 }
  0xcd   :  { %507 = vst [vmem:[#allocation8 + $0x28] sm:$0xff] %v491_v55  }
  0xce   :  { %509 = vst [vmem:[#allocation8 + $0x38] sm:$0xff] %v501_v56  }
  0xcf   :  { %375 = dma.vmem_to_hbm [thread:$0]  %s368_s24, 1024, %s370_s27, [#allocation5], %s619_s20, %s619_s20, %s620_s21  }
  0xd0   :  { %616 = dma.done.wait [#allocation5], 1024  }
  0xd1   :  { %617 = vsyncadd [#allocation5], 4294966272 }
  0xd2   :  { %380 = vsyncpa [#allocation4], 1 }
  0xd3   :  { %381 = vsyncpa [#allocation7], 1 }
  0xd4   :  { %382 = vsyncpa [#allocation5], 1 }

</bundles_post_ra>
